<compile_context>
chip_gen: v5e
topology: v5e:2x2
jax: 0.10.0
libtpu: 0.0.40
codegen_flags: <defaults>
</compile_context>

<pallas_src>
import functools
from typing import NamedTuple

import jax
import jax.numpy as jnp
from jax.experimental import pallas as pl
from jax.experimental.pallas import tpu as pltpu


def _round_up(x: int, m: int) -> int:
    return ((x + m - 1) // m) * m


class LinearPlan(NamedTuple):
    """Static tiling plan fixed at parameter-prep time."""
    tn: int
    tk: int
    Kp: int   # padded in_features
    Np: int   # padded out_features
    K: int    # original in_features
    N: int    # original out_features


def _linear_kernel(x_ref, w_ref, b_ref, o_ref):
    # x_ref: (tm, tk)  w_ref: (tk, tn)  b_ref: (1, tn)  o_ref: (tm, tn) f32
    k = pl.program_id(2)

    @pl.when(k == 0)
    def _():
        # Fold the bias into the accumulator init; the f32 output tile is the
        # accumulator (no separate VMEM scratch, no epilogue copy/cast).
        o_ref[...] = jnp.broadcast_to(b_ref[...], o_ref.shape)

    # Canonical (M,K)x(K,N) contraction on the MXU; weight was pre-transposed
    # once at prep time, so no per-tile transpose here.
    o_ref[...] += jnp.dot(x_ref[...], w_ref[...],
                          preferred_element_type=jnp.float32)


def prepare_linear_params(weight, bias, *, tn=512, tk=1024):
    """One-time parameter prep: transpose weight to (K, N) and zero-pad to tile
    multiples. Do this when the module is built, NOT per forward call."""
    N, K = weight.shape
    assert bias.shape == (N,)

    Kl = _round_up(K, 128)
    Nl = _round_up(N, 128)
    tk = min(tk, Kl)
    tn = min(tn, Nl)
    # v7x dual-TC: keep >= 2 blocks on the N ("parallel") axis whenever N spans
    # at least two lane groups, so a single-M-block problem still uses both TCs.
    if Nl >= 256:
        tn = min(tn, _round_up(Nl // 2, 128))

    Kp = _round_up(K, tk)
    Np = _round_up(N, tn)

    # (K, N) layout, zero-padded; K-padding contributes 0 to the dot, N-padding
    # columns are sliced off after the kernel.
    w_t = jnp.pad(weight.T, ((0, Kp - K), (0, Np - N)))
    bias2d = jnp.pad(bias, (0, Np - N)).reshape(1, Np)

    return w_t, bias2d, LinearPlan(tn=tn, tk=tk, Kp=Kp, Np=Np, K=K, N=N)


def _vmem_limit_bytes(tm, tn, tk):
    try:
        cap = pltpu.get_tpu_info().vmem_capacity_bytes
    except Exception:
        cap = 64 * 1024 * 1024  # conservative (v7x-sized) fallback
    # f32, double-buffered x / W tiles + double-buffered resident output + bias.
    need = 4 * (2 * tm * tk + 2 * tk * tn + 2 * tm * tn + 2 * tn)
    budget = int(cap * 0.75)                      # leave headroom for the rest
    limit = min(max(2 * need, 32 * 1024 * 1024), budget)
    return max(limit, need + (2 << 20))           # never below actual tile need


@functools.partial(jax.jit, static_argnames=("plan", "tm"))
def linear_forward(x, w_t, bias2d, *, plan: LinearPlan, tm=512):
    """y = x @ weight.T + bias with pre-prepped (transposed+padded) weight."""
    B, K = x.shape
    assert K == plan.K, "in_features mismatch"

    tm = min(tm, _round_up(B, 8))       # f32 sublane multiple
    Bp = _round_up(B, tm)

    # Only x is padded per call (K zero-padding contributes 0 to the dot).
    if (Bp, plan.Kp) != (B, K):
        x = jnp.pad(x, ((0, Bp - B), (0, plan.Kp - K)))

    tn, tk, Kp, Np = plan.tn, plan.tk, plan.Kp, plan.Np
    grid = (Bp // tm, Np // tn, Kp // tk)

    cost = pl.CostEstimate(
        flops=2 * Bp * Kp * Np,
        transcendentals=0,
        # Count panel re-reads: x streamed Np/tn times, W streamed Bp/tm times.
        bytes_accessed=4 * (Bp * Kp * (Np // tn)
                            + Kp * Np * (Bp // tm)
                            + Bp * Np + Np),
    )

    out = pl.pallas_call(
        _linear_kernel,
        out_shape=jax.ShapeDtypeStruct((Bp, Np), jnp.float32),
        grid_spec=pltpu.PrefetchScalarGridSpec(
            num_scalar_prefetch=0,
            grid=grid,
            in_specs=[
                # NOTE: if a profile still shows exposed DMA at K-step
                # boundaries, add pipeline_mode=pl.Buffered(3) to x / W specs.
                pl.BlockSpec((tm, tk), lambda i, j, k: (i, k)),   # x tile
                pl.BlockSpec((tk, tn), lambda i, j, k: (k, j)),   # W^T tile
                pl.BlockSpec((1, tn), lambda i, j, k: (0, j)),    # bias tile
            ],
            out_specs=pl.BlockSpec((tm, tn), lambda i, j, k: (i, j)),
        ),
        compiler_params=pltpu.CompilerParams(
            dimension_semantics=("parallel", "parallel", "arbitrary"),
            vmem_limit_bytes=_vmem_limit_bytes(tm, tn, tk),
        ),
        cost_estimate=cost,
    )(x, w_t, bias2d)

    if (Bp, Np) != (B, plan.N):
        out = out[:B, :plan.N]
    return out


def safe_fractional_linear(x, weight, bias):
    """Convenience one-shot API matching F.linear(x, weight, bias).
    Prefer prepare_linear_params() once + linear_forward() per call."""
    w_t, bias2d, plan = prepare_linear_params(weight, bias)
    return linear_forward(x, w_t, bias2d, plan=plan)


if __name__ == "__main__":
    # Mirrors SafeFractionalLinear.__init__:
    #   weight = randn(out_features, in_features) * 0.05, bias = zeros(out_features)
    in_features = 32
    out_features = 16
    batch = 8

    key = jax.random.PRNGKey(0)
    k_w, k_x = jax.random.split(key)

    weight = jax.random.normal(k_w, (out_features, in_features), jnp.float32) * 0.05
    bias = jnp.zeros((out_features,), jnp.float32)
    x = jax.random.normal(k_x, (batch, in_features), jnp.float32)

    # One-time parameter prep (transpose + pad), then the per-call forward.
    w_t, bias2d, plan = prepare_linear_params(weight, bias)
    y = linear_forward(x, w_t, bias2d, plan=plan)
    y = jax.block_until_ready(y)

    # Reference check against plain JAX (same math as torch.nn.functional.linear).
    y_ref = x @ weight.T + bias
    assert y.shape == (batch, out_features)
    assert jnp.allclose(y, y_ref, atol=1e-5, rtol=1e-5)

    # TODO(synk): get_fractional_representation() is host-side Fraction
    # introspection of weights, not a tensor op — no kernel equivalent.

    print("KERNEL_OK")
</pallas_src>

<mosaic_0001>
module attributes {stable_mosaic.version = 11 : i64} {
  func.func @_linear_kernel(%arg0: i32, %arg1: i32, %arg2: i32, %arg3: memref<8x128xf32, #tpu.memory_space<vmem>>, %arg4: memref<128x128xf32, #tpu.memory_space<vmem>>, %arg5: memref<1x128xf32, #tpu.memory_space<vmem>>, %arg6: memref<8x128xf32, #tpu.memory_space<vmem>>) attributes {dimension_semantics = [#tpu.dimension_semantics<parallel>, #tpu.dimension_semantics<parallel>, #tpu.dimension_semantics<arbitrary>], iteration_bounds = array<i64: 1, 1, 1>, scalar_prefetch = 0 : i64, scratch_operands = 0 : i64, tpu.core_type = #tpu.core_type<tc>, window_params = [{transform_indices = @transform_0, window_bounds = array<i64: 8, 128>}, {transform_indices = @transform_1, window_bounds = array<i64: 128, 128>}, {transform_indices = @transform_2, window_bounds = array<i64: 1, 128>}, {transform_indices = @transform_3, window_bounds = array<i64: 8, 128>}]} {
    %c0_i32 = arith.constant 0 : i32
    %0 = arith.cmpi eq, %arg2, %c0_i32 : i32
    %1 = arith.extui %0 : i1 to i32
    %c0_i32_0 = arith.constant 0 : i32
    %2 = arith.cmpi ne, %1, %c0_i32_0 : i32
    scf.if %2 {
      %c0_8 = arith.constant 0 : index
      %c0_9 = arith.constant 0 : index
      %9 = vector.load %arg5[%c0_8, %c0_9] : memref<1x128xf32, #tpu.memory_space<vmem>>, vector<1x128xf32>
      %10 = vector.shape_cast %9 : vector<1x128xf32> to vector<1x128xf32>
      %11 = vector.broadcast %10 : vector<1x128xf32> to vector<8x128xf32>
      %c0_10 = arith.constant 0 : index
      %c0_11 = arith.constant 0 : index
      %12 = vector.load %arg6[%c0_10, %c0_11] : memref<8x128xf32, #tpu.memory_space<vmem>>, vector<8x128xf32>
      tpu.vector_store %arg6[%c0_10, %c0_11], %11 {strides = array<i32>} : memref<8x128xf32, #tpu.memory_space<vmem>>, vector<8x128xf32>,
    } else {
    }
    %c0 = arith.constant 0 : index
    %c0_1 = arith.constant 0 : index
    %3 = vector.load %arg6[%c0, %c0_1] : memref<8x128xf32, #tpu.memory_space<vmem>>, vector<8x128xf32>
    %c0_2 = arith.constant 0 : index
    %c0_3 = arith.constant 0 : index
    %4 = vector.load %arg3[%c0_2, %c0_3] : memref<8x128xf32, #tpu.memory_space<vmem>>, vector<8x128xf32>
    %c0_4 = arith.constant 0 : index
    %c0_5 = arith.constant 0 : index
    %5 = vector.load %arg4[%c0_4, %c0_5] : memref<128x128xf32, #tpu.memory_space<vmem>>, vector<128x128xf32>
    %cst = arith.constant dense<0.000000e+00> : vector<8x128xf32>
    %6 = tpu.matmul %4, %5, %cst {dimension_numbers = #tpu.dot_dimension_numbers<[1], [0], [0], [1], [0, 0, 1, 1], [], []>} : vector<8x128xf32>, vector<128x128xf32>, vector<8x128xf32> -> vector<8x128xf32>
    %7 = arith.addf %3, %6 : vector<8x128xf32>
    %c0_6 = arith.constant 0 : index
    %c0_7 = arith.constant 0 : index
    %8 = vector.load %arg6[%c0_6, %c0_7] : memref<8x128xf32, #tpu.memory_space<vmem>>, vector<8x128xf32>
    tpu.vector_store %arg6[%c0_6, %c0_7], %7 {strides = array<i32>} : memref<8x128xf32, #tpu.memory_space<vmem>>, vector<8x128xf32>,
    return
  }
  func.func @transform_0(%arg0: i32, %arg1: i32, %arg2: i32) -> (i32, i32) {
    %c0_i32 = arith.constant 0 : i32
    return %arg0, %arg2 : i32, i32
  }
  func.func @transform_1(%arg0: i32, %arg1: i32, %arg2: i32) -> (i32, i32) {
    %c0_i32 = arith.constant 0 : i32
    return %arg2, %arg1 : i32, i32
  }
  func.func @transform_2(%arg0: i32, %arg1: i32, %arg2: i32) -> (i32, i32) {
    %c0_i32 = arith.constant 0 : i32
    %c0_i32_0 = arith.constant 0 : i32
    return %c0_i32, %arg1 : i32, i32
  }
  func.func @transform_3(%arg0: i32, %arg1: i32, %arg2: i32) -> (i32, i32) {
    %c0_i32 = arith.constant 0 : i32
    return %arg0, %arg1 : i32, i32
  }
}

</mosaic_0001>

<bundles_post_ra>
// kernel: linear_forward.1
= control target key start
LH: loop header
LB: loop body
LE: loop exit
PB: predicated region body
PF: predicated region fallthrough
CT: control target
= control target key end

     0   :  { %8 = vsyncpa [#allocation3], 0  ;;  %s190_s0 = inlined_call_operand.vmem [shape: f32[8,128], index: 0, kind: input, shape index: {}]   ;;  %s191_s1 = inlined_call_operand.hbm [shape: f32[128,128], index: 1, kind: input, shape index: {}]   ;;  %s192_s2 = inlined_call_operand.vmem [shape: f32[1,128], index: 2, kind: input, shape index: {}]   ;;  %s193_s3 = inlined_call_operand.hbm [shape: f32[8,128], index: 3, kind: output, shape index: {}]  }
   0x1   :  { %9 = vsyncpa [#allocation4], 0  ;;  %s16_s14 = sshll.u32 %s191_s1, 4  ;;  %s154_s15 = smov [#allocation2]   ;;  %s17_s14 = int_to_ptr.hbm [resolvable:$true] %s16_s14 }
   0x2   :  { %s18_s16 = sshll.u32 %s154_s15, 4  ;;  %s155_s17 = smov 128   ;;  %s19_s16 = int_to_ptr.vmem [resolvable:$true] %s18_s16 }
   0x3   :  { %s156_s18 = smov 8  }
   0x4   :  { %24 = dma.hbm_to_vmem [thread:$0]  %s17_s14, 2048, %s19_s16, [#allocation3], %s155_s17, %s155_s17, %s156_s18  }
   0x5   :  { %150 = dma.done.wait [#allocation3], 2048  }
   0x6   :  { %151 = vsyncadd [#allocation3], 4294965248  ;;  %v57_v0 = vld [vmem:[#allocation2 + $0x78] sm:$0xff]  ;;  %v56_v1 = vld [vmem:[#allocation2 + $0x70] sm:$0xff]  ;;  %s157_s22 = smov [#allocation5]   ;;  %s87_s26 = sshll.u32 %s193_s3, 4  ;;  %s88_s26 = int_to_ptr.hbm [resolvable:$true] %s87_s26 }
   0x7   :  { %58 = vmatpush.msra.mxu0 %v57_v0  ;;  %v55_v2 = vld [vmem:[#allocation2 + $0x68] sm:$0xff]  ;;  %v54_v3 = vld [vmem:[#allocation2 + $0x60] sm:$0xff]  ;;  %v53_v4 = vld [vmem:[#allocation2 + $0x58] sm:$0xff]  ;;  %s85_s23 = sshll.u32 %s157_s22, 4  ;;  %s86_s23 = int_to_ptr.vmem [resolvable:$true] %s85_s23 }
   0x8   :  { %v52_v5 = vld [vmem:[#allocation2 + $0x50] sm:$0xff]  ;;  %v51_v6 = vld [vmem:[#allocation2 + $0x48] sm:$0xff]  ;;  %v50_v7 = vld [vmem:[#allocation2 + $0x40] sm:$0xff] }
   0x9   :  { %59 = vmatpush.msra.mxu0 %v56_v1  ;;  %v49_v8 = vld [vmem:[#allocation2 + $0x38] sm:$0xff]  ;;  %v48_v9 = vld [vmem:[#allocation2 + $0x30] sm:$0xff]  ;;  %v47_v10 = vld [vmem:[#allocation2 + $0x28] sm:$0xff] }
   0xa   :  { %v46_v11 = vld [vmem:[#allocation2 + $0x20] sm:$0xff]  ;;  %v45_v12 = vld [vmem:[#allocation2 + $0x18] sm:$0xff]  ;;  %v44_v13 = vld [vmem:[#allocation2 + $0x10] sm:$0xff] }
   0xb   :  { %60 = vmatpush.msra.mxu0 %v55_v2  ;;  %v43_v14 = vld [vmem:[#allocation2 + $0x8] sm:$0xff]  ;;  %v42_v15 = vld [vmem:[#allocation2] sm:$0xff] }
   0xc   :  { %v41_v16 = vld [vmem:[%s190_s0] sm:$0xff] }
   0xd   :  { %61 = vmatpush.msra.mxu0 %v54_v3  ;;  %v101_v17 = vld [vmem:[%s192_s2] ss:$0 sm:$0xff] }
   0xf   :  { %62 = vmatpush.msra.mxu0 %v53_v4 }
  0x11   :  { %63 = vmatpush.msra.mxu0 %v52_v5 }
  0x13   :  { %64 = vmatpush.msra.mxu0 %v51_v6 }
  0x15   :  { %65 = vmatpush.msra.mxu0 %v50_v7 }
  0x17   :  { %66 = vmatpush.msra.mxu0 %v49_v8 }
  0x19   :  { %67 = vmatpush.msra.mxu0 %v48_v9 }
  0x1b   :  { %68 = vmatpush.msra.mxu0 %v47_v10 }
  0x1d   :  { %69 = vmatpush.msra.mxu0 %v46_v11 }
  0x1f   :  { %70 = vmatpush.msra.mxu0 %v45_v12 }
  0x21   :  { %71 = vmatpush.msra.mxu0 %v44_v13 }
  0x23   :  { %72 = vmatpush.msra.mxu0 %v43_v14 }
  0x25   :  { %73 = vmatpush.msra.mxu0 %v42_v15 }
  0x26   :  { %74 = vmatmul.f32.vlgmr.msra.gmra.mxu0 %v41_v16 }
  0xa3   :  { %v75_v18 = vpop.f32.mrf.mxu0 }
  0xa4   :  { %v78_v19 = vadd.f32 %v101_v17, %v75_v18 }
  0xa6   :  { %79 = vst [vmem:[#allocation5] sm:$0xff] %v78_v19 }
  0xa7   :  { %90 = dma.vmem_to_hbm [thread:$0]  %s86_s23, 128, %s88_s26, [#allocation4]  }
  0xa8   :  { %152 = dma.done.wait [#allocation4], 128  }
  0xa9   :  { %153 = vsyncadd [#allocation4], 4294967168 }
  0xaa   :  { %95 = vsyncpa [#allocation3], 1 }
  0xab   :  { %96 = vsyncpa [#allocation4], 1 }

</bundles_post_ra>
